<compile_context>
chip_gen: v5e
topology: v5e:2x2
jax: 0.10.0
libtpu: 0.0.40
codegen_flags: <defaults>
</compile_context>

<pallas_src>
import numpy as np
import jax
import jax.numpy as jnp
from jax import lax
from jax.experimental import pallas as pl
from jax.experimental.pallas import tpu as pltpu


LANE = 128          # TPU lane width; every slab / params row is this wide
NC_PAD = 128        # pad num_classes to a full lane -> unmasked output store
H_SLOT = 128        # lane slot reserved for the concatenated hidden vector


# ------------------------------------------------------------------
# Pallas kernel: per-stage sublane pool -> fused squeeze Linear + ReLU
# -> fused head Linear (+ sum over the four heads).
# Single invocation, no grid, two input DMAs, one lane-dense output store.
#
# TODO(synk): at realistic ResNet feature sizes this must become a gridded,
# pipelined reduction over H*W (pooled accumulator + pl.when init/finalize,
# dimension_semantics=("parallel","arbitrary")) so features fit VMEM and both
# v7x TensorCores are used; at the toy 8x8 / B=2 shapes here a grid only adds
# per-step overhead, so the kernel stays grid-less.
# ------------------------------------------------------------------
def _make_kernel(stage_rows, k_total):
    """stage_rows: static ((row_offset, n_rows), ...) per backbone stage inside
    the concatenated lane-dense feature slab."""

    def kernel(feat_ref, params_ref, out_ref):
        # feat_ref   : (B, R_total, 128) f32  lane-folded stage features
        # params_ref : (648, 128) f32   [wsq_blk | wh_stack | bsq row | bh row]
        # out_ref    : (B, 128) f32

        # Global average pool per stage: plain sublane sums (the 1/(H*W) scale
        # is folded into the squeeze weights).  Results stay in vregs -- no
        # scratch buffer, no zero init, no masked partial stores.
        partials = [
            jnp.sum(feat_ref[:, off:off + rows, :], axis=1)          # (B, 128)
            for off, rows in stage_rows
        ]
        pooled = jnp.concatenate(partials, axis=-1)                  # (B, S*128)

        wsq = params_ref[0:k_total, :]                               # (S*128, 128)
        wh = params_ref[k_total:k_total + H_SLOT, :]                 # (128, 128)
        b2 = params_ref[k_total + H_SLOT:k_total + H_SLOT + 2, :]    # (2, 128)

        # Fused squeeze Linears (+ ReLU): one MXU call against the
        # block-diagonal, g-replicated, 1/(H*W)-scaled squeeze weights.
        hidden = jnp.maximum(
            jnp.dot(pooled, wsq, preferred_element_type=jnp.float32)
            + b2[0:1, :],
            0.0,
        )                                                            # (B, 128)

        # Fused heads + sum over heads: one contraction over the stacked
        # hidden vector; the head-bias sum is pre-folded into b2[1].
        out_ref[...] = (
            jnp.dot(hidden, wh, preferred_element_type=jnp.float32) + b2[1:2, :]
        )                                                            # (B, 128)

    return kernel


def multihead_sum(feat_slab, params, stage_rows, k_total):
    B = feat_slab.shape[0]
    vmem = pl.BlockSpec(memory_space=pltpu.MemorySpace.VMEM)
    return pl.pallas_call(
        _make_kernel(stage_rows, k_total),
        out_shape=jax.ShapeDtypeStruct((B, NC_PAD), jnp.float32),
        in_specs=[vmem, vmem],
        out_specs=vmem,
    )(feat_slab, params)


# ------------------------------------------------------------------
# Frozen synthetic backbone (plain-JAX glue; stands in for the pretrained
# ResNet feature extractor run under torch.no_grad()).  NHWC layout so the
# stage features reshape to the lane-dense kernel layout with no transposes.
# ------------------------------------------------------------------
# TODO(synk): the pretrained ResNet backbone cannot be loaded here; it is
# replaced by a deterministic frozen conv stack with matching feature dims.
def conv2d(x, w, stride):
    return lax.conv_general_dilated(
        x, w, (stride, stride), "SAME",
        dimension_numbers=("NHWC", "HWIO", "NHWC"))


def maxpool3x3s2(x):
    return lax.reduce_window(
        x, -jnp.inf, lax.max,
        window_dimensions=(1, 3, 3, 1),
        window_strides=(1, 2, 2, 1),
        padding="SAME")


def make_backbone_params(key, feature_dims):
    keys = jax.random.split(key, 1 + len(feature_dims))
    c0 = feature_dims[0]
    params = {
        "conv1": 0.1 * jax.random.normal(keys[0], (3, 3, 3, c0), jnp.float32),
        "bn1_gamma": jnp.ones((c0,), jnp.float32),
        "bn1_beta": jnp.zeros((c0,), jnp.float32),
    }
    in_c = c0
    for i, out_c in enumerate(feature_dims):
        params[f"layer{i+1}"] = 0.1 * jax.random.normal(
            keys[1 + i], (3, 3, in_c, out_c), jnp.float32)
        in_c = out_c
    return params


def backbone_forward(params, x_nchw):
    x = jnp.transpose(x_nchw, (0, 2, 3, 1))      # NCHW -> NHWC (3 channels, cheap)
    # stem
    x = conv2d(x, params["conv1"], stride=2)
    x = x * params["bn1_gamma"] + params["bn1_beta"]
    x = jnp.maximum(x, 0.0)
    x = maxpool3x3s2(x)
    # stages
    f1 = jnp.maximum(conv2d(x,  params["layer1"], stride=1), 0.0)
    f2 = jnp.maximum(conv2d(f1, params["layer2"], stride=2), 0.0)
    f3 = jnp.maximum(conv2d(f2, params["layer3"], stride=2), 0.0)
    f4 = jnp.maximum(conv2d(f3, params["layer4"], stride=2), 0.0)
    return [f1, f2, f3, f4]                      # NHWC stage features


# ------------------------------------------------------------------
# Head parameters (the module's own parameters): per-stage Linear + Linear,
# packed once into a single lane-dense params array.
# ------------------------------------------------------------------
def make_head_params(key, feature_dims, hidden_dim, num_classes):
    params = []
    for c in feature_dims:
        k1, k2, k3, k4, key = jax.random.split(key, 5)
        wsq = (1.0 / np.sqrt(c)) * jax.random.normal(k1, (c, hidden_dim), jnp.float32)
        bsq = 0.01 * jax.random.normal(k2, (hidden_dim,), jnp.float32)
        wh = (1.0 / np.sqrt(hidden_dim)) * jax.random.normal(
            k3, (hidden_dim, num_classes), jnp.float32)
        bh = 0.01 * jax.random.normal(k4, (num_classes,), jnp.float32)
        params.append((wsq, bsq, wh, bh))
    return params


def pack_params(head_params, feature_dims, hw_list, hidden_dim, num_classes):
    """One-time packing of ALL module parameters into a single (648, 128) array
    (one input DMA for the kernel):

      rows [0, S*128)          block-diagonal squeeze weights; each stage's
                               (C, hidden) block is scaled by 1/(H*W) and
                               replicated g = 128/C times along K to match the
                               lane-folded feature slab
      rows [S*128, S*128+128)  vertically stacked head weights (lane-padded)
      row  S*128 + 128         concatenated squeeze biases
      row  S*128 + 129         summed head biases
    """
    S = len(head_params)
    h_total = S * hidden_dim
    assert h_total <= H_SLOT, "S * hidden_dim must fit one 128-lane slot"
    assert num_classes <= NC_PAD, "num_classes must be <= 128"
    k_total = S * LANE

    n_rows = k_total + H_SLOT + 2
    n_rows_pad = ((n_rows + 7) // 8) * 8
    P = jnp.zeros((n_rows_pad, LANE), jnp.float32)

    for s, (wsq, bsq, wh, bh) in enumerate(head_params):
        c = feature_dims[s]
        g = LANE // c
        blk = jnp.tile(wsq / float(hw_list[s]), (g, 1))          # (128, hidden)
        h0 = s * hidden_dim
        P = P.at[s * LANE:(s + 1) * LANE, h0:h0 + hidden_dim].set(blk)
        P = P.at[k_total + h0:k_total + h0 + hidden_dim, :num_classes].set(wh)
        P = P.at[k_total + H_SLOT, h0:h0 + hidden_dim].set(bsq)
        P = P.at[k_total + H_SLOT + 1, :num_classes].add(bh)
    return P, k_total


def reference_heads(features_nhwc, head_params):
    out = 0.0
    for f, (wsq, bsq, wh, bh) in zip(features_nhwc, head_params):
        pooled = jnp.mean(f, axis=(1, 2))                 # AdaptiveAvgPool2d((1,1))
        hidden = jnp.maximum(pooled @ wsq + bsq, 0.0)     # squeeze Linear + ReLU
        out = out + hidden @ wh + bh                      # head Linear, summed
    return out


if __name__ == "__main__":
    B, num_classes, hidden_dim = 2, 10, 32
    feature_dims = [16, 32, 64, 128]

    key = jax.random.PRNGKey(0)
    kx, kb, kh = jax.random.split(key, 3)

    x = jax.random.normal(kx, (B, 3, 32, 32), jnp.float32)      # NCHW input
    backbone_params = make_backbone_params(kb, feature_dims)
    head_params = make_head_params(kh, feature_dims, hidden_dim, num_classes)

    # Static per-stage geometry from the fixed backbone output shapes (no device work).
    feat_shapes = jax.eval_shape(lambda xx: backbone_forward(backbone_params, xx), x)
    hw_list = [int(s.shape[1] * s.shape[2]) for s in feat_shapes]     # NHWC H*W
    g_list = [LANE // c for c in feature_dims]
    for c, g, hw in zip(feature_dims, g_list, hw_list):
        assert LANE % c == 0 and hw % g == 0, "stage does not lane-fold cleanly"
    rows_list = [hw // g for hw, g in zip(hw_list, g_list)]
    offs = np.cumsum([0] + rows_list)
    stage_rows = tuple((int(o), int(r)) for o, r in zip(offs[:-1], rows_list))

    # One-time, on-device packing of all head parameters into ONE array.
    params_packed, k_total = pack_params(
        head_params, feature_dims, hw_list, hidden_dim, num_classes)

    @jax.jit
    def forward(inp, bparams, packed):
        # Frozen backbone (glue, plain JAX) -> NHWC intermediate features f1..f4.
        feats = backbone_forward(bparams, inp)
        # Lane-dense fold: (B, H, W, C) -> (B, HW/g, g*C) with g*C = 128, then
        # concatenate all stages along the sublane axis.  Pure reshapes -- no
        # transposes, no extra HBM traffic, one contiguous feature DMA.
        slabs = [
            f.reshape(f.shape[0], (f.shape[1] * f.shape[2]) // g, g * c)
            for f, g, c in zip(feats, g_list, feature_dims)
        ]
        feat_slab = jnp.concatenate(slabs, axis=1)        # (B, 15, 128)
        # Pallas kernel: pool + fused squeeze + ReLU + fused heads + sum.
        out_padded = multihead_sum(feat_slab, packed, stage_rows, k_total)
        return out_padded[:, :num_classes]

    out = jax.block_until_ready(forward(x, backbone_params, params_packed))

    features = backbone_forward(backbone_params, x)
    ref = jax.block_until_ready(reference_heads(features, head_params))
    np.testing.assert_allclose(np.asarray(out), np.asarray(ref), rtol=1e-4, atol=1e-4)

    print("KERNEL_OK")
</pallas_src>

<mosaic_0001>
module attributes {stable_mosaic.version = 11 : i64} {
  func.func @kernel(%arg0: memref<2x15x128xf32, #tpu.memory_space<vmem>>, %arg1: memref<648x128xf32, #tpu.memory_space<vmem>>, %arg2: memref<2x128xf32, #tpu.memory_space<vmem>>) attributes {dimension_semantics = [], scalar_prefetch = 0 : i64, scratch_operands = 0 : i64, tpu.core_type = #tpu.core_type<tc>} {
    %c0 = arith.constant 0 : index
    %c0_0 = arith.constant 0 : index
    %c0_1 = arith.constant 0 : index
    %0 = vector.load %arg0[%c0, %c0_0, %c0_1] : memref<2x15x128xf32, #tpu.memory_space<vmem>>, vector<2x8x128xf32>
    %cst = arith.constant dense<0.000000e+00> : vector<2x128xf32>
    %1 = vector.multi_reduction <add>, %0, %cst [1] : vector<2x8x128xf32> to vector<2x128xf32>
    %c0_2 = arith.constant 0 : index
    %c8 = arith.constant 8 : index
    %c0_3 = arith.constant 0 : index
    %2 = vector.load %arg0[%c0_2, %c8, %c0_3] : memref<2x15x128xf32, #tpu.memory_space<vmem>>, vector<2x4x128xf32>
    %cst_4 = arith.constant dense<0.000000e+00> : vector<2x128xf32>
    %3 = vector.multi_reduction <add>, %2, %cst_4 [1] : vector<2x4x128xf32> to vector<2x128xf32>
    %c0_5 = arith.constant 0 : index
    %c12 = arith.constant 12 : index
    %c0_6 = arith.constant 0 : index
    %4 = vector.load %arg0[%c0_5, %c12, %c0_6] : memref<2x15x128xf32, #tpu.memory_space<vmem>>, vector<2x2x128xf32>
    %cst_7 = arith.constant dense<0.000000e+00> : vector<2x128xf32>
    %5 = vector.multi_reduction <add>, %4, %cst_7 [1] : vector<2x2x128xf32> to vector<2x128xf32>
    %c0_8 = arith.constant 0 : index
    %c14 = arith.constant 14 : index
    %c0_9 = arith.constant 0 : index
    %6 = vector.load %arg0[%c0_8, %c14, %c0_9] : memref<2x15x128xf32, #tpu.memory_space<vmem>>, vector<2x1x128xf32>
    %cst_10 = arith.constant dense<0.000000e+00> : vector<2x128xf32>
    %7 = vector.multi_reduction <add>, %6, %cst_10 [1] : vector<2x1x128xf32> to vector<2x128xf32>
    %8 = tpu.concatenate %1, %3, %5, %7 in 1 : vector<2x128xf32>, vector<2x128xf32>, vector<2x128xf32>, vector<2x128xf32> -> vector<2x512xf32>
    %c0_11 = arith.constant 0 : index
    %c0_12 = arith.constant 0 : index
    %9 = vector.load %arg1[%c0_11, %c0_12] : memref<648x128xf32, #tpu.memory_space<vmem>>, vector<512x128xf32>
    %c512 = arith.constant 512 : index
    %c0_13 = arith.constant 0 : index
    %10 = vector.load %arg1[%c512, %c0_13] : memref<648x128xf32, #tpu.memory_space<vmem>>, vector<128x128xf32>
    %c640 = arith.constant 640 : index
    %c0_14 = arith.constant 0 : index
    %11 = vector.load %arg1[%c640, %c0_14] : memref<648x128xf32, #tpu.memory_space<vmem>>, vector<2x128xf32>
    %cst_15 = arith.constant dense<0.000000e+00> : vector<2x128xf32>
    %12 = tpu.matmul %8, %9, %cst_15 {dimension_numbers = #tpu.dot_dimension_numbers<[1], [0], [0], [1], [0, 0, 1, 1], [], []>} : vector<2x512xf32>, vector<512x128xf32>, vector<2x128xf32> -> vector<2x128xf32>
    %13 = vector.extract_strided_slice %11 {offsets = [0, 0], sizes = [1, 128], strides = [1, 1]} : vector<2x128xf32> to vector<1x128xf32>
    %14 = vector.broadcast %13 : vector<1x128xf32> to vector<2x128xf32>
    %15 = arith.addf %12, %14 : vector<2x128xf32>
    %cst_16 = arith.constant 0.000000e+00 : f32
    %16 = vector.broadcast %cst_16 : f32 to vector<2x128xf32>
    %17 = arith.maximumf %15, %16 : vector<2x128xf32>
    %cst_17 = arith.constant dense<0.000000e+00> : vector<2x128xf32>
    %18 = tpu.matmul %17, %10, %cst_17 {dimension_numbers = #tpu.dot_dimension_numbers<[1], [0], [0], [1], [0, 0, 1, 1], [], []>} : vector<2x128xf32>, vector<128x128xf32>, vector<2x128xf32> -> vector<2x128xf32>
    %19 = vector.extract_strided_slice %11 {offsets = [1, 0], sizes = [1, 128], strides = [1, 1]} : vector<2x128xf32> to vector<1x128xf32>
    %20 = vector.broadcast %19 : vector<1x128xf32> to vector<2x128xf32>
    %21 = arith.addf %18, %20 : vector<2x128xf32>
    %c0_18 = arith.constant 0 : index
    %c0_19 = arith.constant 0 : index
    %22 = vector.load %arg2[%c0_18, %c0_19] : memref<2x128xf32, #tpu.memory_space<vmem>>, vector<2x128xf32>
    tpu.vector_store %arg2[%c0_18, %c0_19], %21 {strides = array<i32>} : memref<2x128xf32, #tpu.memory_space<vmem>>, vector<2x128xf32>,
    return
  }
}

</mosaic_0001>

<bundles_post_ra>
// kernel: reverse
= control target key start
LH: loop header
LB: loop body
LE: loop exit
PB: predicated region body
PF: predicated region fallthrough
CT: control target
= control target key end

     0   :  { %s944_s0 = inlined_call_operand.vmem [shape: f32[3,3,64,128], index: 0, kind: input, shape index: {}]   ;;  %s945_s1 = inlined_call_operand.vmem [shape: bf16[3,3,64,128], index: 1, kind: output, shape index: {}]  }
   0x1   :  { %v360_v0 = vld [vmem:[%s944_s0 + $0x200] sm:$0xff]  ;;  %v376_v16 = vld [vmem:[%s944_s0 + $0x208] sm:$0xff]  ;;  %v394_v34 = vld [vmem:[%s944_s0 + $0x210] sm:$0xff] }
   0x2   :  { %v361_v1 = vld [vmem:[%s944_s0 + $0x140] sm:$0xff]  ;;  %v4_v3 = vpack.c.bf16 0.0, %v360_v0  ;;  %v378_v18 = vld [vmem:[%s944_s0 + $0x148] sm:$0xff]  ;;  %v48_v21 = vpack.c.bf16 0.0, %v376_v16  ;;  %v396_v36 = vld [vmem:[%s944_s0 + $0x150] sm:$0xff]  ;;  %v93_v39 = vpack.c.bf16 0.0, %v394_v34 }
   0x3   :  { %v363_v2 = vld [vmem:[%s944_s0 + $0x80] sm:$0xff]  ;;  %v9_v4 = vpack.c.bf16 0.0, %v361_v1  ;;  %v380_v20 = vld [vmem:[%s944_s0 + $0x88] sm:$0xff]  ;;  %v53_v23 = vpack.c.bf16 0.0, %v378_v18  ;;  %v398_v38 = vld [vmem:[%s944_s0 + $0x90] sm:$0xff]  ;;  %v98_v41 = vpack.c.bf16 0.0, %v396_v36 }
   0x4   :  { %v14_v5 = vpack.c.bf16 0.0, %v363_v2  ;;  %v365_v6 = vld [vmem:[%s944_s0 + $0x1c0] sm:$0xff]  ;;  %5 = vst [vmem:[%s945_s1] sm:$0xf] %v4_v3  ;;  %v382_v22 = vld [vmem:[%s944_s0 + $0x1c8] sm:$0xff]  ;;  %v58_v25 = vpack.c.bf16 0.0, %v380_v20  ;;  %v400_v40 = vld [vmem:[%s944_s0 + $0x1d0] sm:$0xff] }
   0x5   :  { %v367_v7 = vld [vmem:[%s944_s0 + $0x100] sm:$0xff]  ;;  %v19_v9 = vpack.c.bf16 0.0, %v365_v6  ;;  %362 = vst [vmem:[%s945_s1 + $0x60] sm:$0xf] %v9_v4  ;;  %v384_v24 = vld [vmem:[%s944_s0 + $0x108] sm:$0xff]  ;;  %v63_v27 = vpack.c.bf16 0.0, %v382_v22 }
   0x6   :  { %v369_v8 = vld [vmem:[%s944_s0 + $0x40] sm:$0xff]  ;;  %v24_v11 = vpack.c.bf16 0.0, %v367_v7  ;;  %364 = vst [vmem:[%s945_s1 + $0xc0] sm:$0xf] %v14_v5  ;;  %v386_v26 = vld [vmem:[%s944_s0 + $0x48] sm:$0xff]  ;;  %v68_v29 = vpack.c.bf16 0.0, %v384_v24 }
   0x7   :  { %v371_v10 = vld [vmem:[%s944_s0 + $0x180] sm:$0xff]  ;;  %v29_v13 = vpack.c.bf16 0.0, %v369_v8  ;;  %366 = vst [vmem:[%s945_s1 + $0x20] sm:$0xf] %v19_v9  ;;  %v388_v28 = vld [vmem:[%s944_s0 + $0x188] sm:$0xff]  ;;  %v73_v31 = vpack.c.bf16 0.0, %v386_v26 }
   0x8   :  { %v373_v12 = vld [vmem:[%s944_s0 + $0xc0] sm:$0xff]  ;;  %v34_v15 = vpack.c.bf16 0.0, %v371_v10  ;;  %368 = vst [vmem:[%s945_s1 + $0x80] sm:$0xf] %v24_v11  ;;  %v390_v30 = vld [vmem:[%s944_s0 + $0xc8] sm:$0xff]  ;;  %v78_v33 = vpack.c.bf16 0.0, %v388_v28 }
   0x9   :  { %v41_v14 = vld [vmem:[%s944_s0] sm:$0xff]  ;;  %v39_v17 = vpack.c.bf16 0.0, %v373_v12  ;;  %370 = vst [vmem:[%s945_s1 + $0xe0] sm:$0xf] %v29_v13  ;;  %v392_v32 = vld [vmem:[%s944_s0 + $0x8] sm:$0xff]  ;;  %v83_v35 = vpack.c.bf16 0.0, %v390_v30 }
   0xa   :  { %v43_v19 = vpack.c.bf16 0.0, %v41_v14  ;;  %372 = vst [vmem:[%s945_s1 + $0x40] sm:$0xf] %v34_v15  ;;  %v88_v37 = vpack.c.bf16 0.0, %v392_v32  ;;  %v402_v42 = vld [vmem:[%s944_s0 + $0x110] sm:$0xff]  ;;  %v103_v43 = vpack.c.bf16 0.0, %v398_v38 }
   0xb   :  { %374 = vst [vmem:[%s945_s1 + $0xa0] sm:$0xf] %v39_v17  ;;  %v404_v44 = vld [vmem:[%s944_s0 + $0x50] sm:$0xff]  ;;  %v108_v45 = vpack.c.bf16 0.0, %v400_v40  ;;  %v113_v47 = vpack.c.bf16 0.0, %v402_v42  ;;  %v412_v52 = vld [vmem:[%s944_s0 + $0x218] sm:$0xff] }
   0xc   :  { %375 = vst [vmem:[%s945_s1 + $0x100] sm:$0xf] %v43_v19  ;;  %v406_v46 = vld [vmem:[%s944_s0 + $0x190] sm:$0xff]  ;;  %v118_v49 = vpack.c.bf16 0.0, %v404_v44  ;;  %v414_v54 = vld [vmem:[%s944_s0 + $0x158] sm:$0xff]  ;;  %v138_v57 = vpack.c.bf16 0.0, %v412_v52 }
   0xd   :  { %377 = vst [vmem:[%s945_s1 + $0x4] sm:$0xf] %v48_v21  ;;  %v408_v48 = vld [vmem:[%s944_s0 + $0xd0] sm:$0xff]  ;;  %v123_v51 = vpack.c.bf16 0.0, %v406_v46  ;;  %v416_v56 = vld [vmem:[%s944_s0 + $0x98] sm:$0xff]  ;;  %v143_v59 = vpack.c.bf16 0.0, %v414_v54 }
   0xe   :  { %379 = vst [vmem:[%s945_s1 + $0x64] sm:$0xf] %v53_v23  ;;  %v410_v50 = vld [vmem:[%s944_s0 + $0x10] sm:$0xff]  ;;  %v128_v53 = vpack.c.bf16 0.0, %v408_v48  ;;  %v418_v58 = vld [vmem:[%s944_s0 + $0x1d8] sm:$0xff]  ;;  %v148_v61 = vpack.c.bf16 0.0, %v416_v56 }
   0xf   :  { %381 = vst [vmem:[%s945_s1 + $0xc4] sm:$0xf] %v58_v25  ;;  %v133_v55 = vpack.c.bf16 0.0, %v410_v50  ;;  %v420_v60 = vld [vmem:[%s944_s0 + $0x118] sm:$0xff]  ;;  %v153_v63 = vpack.c.bf16 0.0, %v418_v58  ;;  %v430_v6 = vld [vmem:[%s944_s0 + $0x220] sm:$0xff] }
  0x10   :  { %383 = vst [vmem:[%s945_s1 + $0x24] sm:$0xf] %v63_v27  ;;  %v422_v62 = vld [vmem:[%s944_s0 + $0x58] sm:$0xff]  ;;  %v158_v1 = vpack.c.bf16 0.0, %v420_v60  ;;  %v432_v8 = vld [vmem:[%s944_s0 + $0x160] sm:$0xff]  ;;  %v183_v11 = vpack.c.bf16 0.0, %v430_v6 }
  0x11   :  { %385 = vst [vmem:[%s945_s1 + $0x84] sm:$0xf] %v68_v29  ;;  %v424_v0 = vld [vmem:[%s944_s0 + $0x198] sm:$0xff]  ;;  %v163_v3 = vpack.c.bf16 0.0, %v422_v62  ;;  %v434_v10 = vld [vmem:[%s944_s0 + $0xa0] sm:$0xff]  ;;  %v188_v13 = vpack.c.bf16 0.0, %v432_v8 }
  0x12   :  { %387 = vst [vmem:[%s945_s1 + $0xe4] sm:$0xf] %v73_v31  ;;  %v426_v2 = vld [vmem:[%s944_s0 + $0xd8] sm:$0xff]  ;;  %v168_v5 = vpack.c.bf16 0.0, %v424_v0  ;;  %v436_v12 = vld [vmem:[%s944_s0 + $0x1e0] sm:$0xff]  ;;  %v193_v15 = vpack.c.bf16 0.0, %v434_v10 }
  0x13   :  { %389 = vst [vmem:[%s945_s1 + $0x44] sm:$0xf] %v78_v33  ;;  %v428_v4 = vld [vmem:[%s944_s0 + $0x18] sm:$0xff]  ;;  %v173_v7 = vpack.c.bf16 0.0, %v426_v2  ;;  %v438_v14 = vld [vmem:[%s944_s0 + $0x120] sm:$0xff]  ;;  %v198_v17 = vpack.c.bf16 0.0, %v436_v12 }
  0x14   :  { %391 = vst [vmem:[%s945_s1 + $0xa4] sm:$0xf] %v83_v35  ;;  %v178_v9 = vpack.c.bf16 0.0, %v428_v4  ;;  %v440_v16 = vld [vmem:[%s944_s0 + $0x60] sm:$0xff]  ;;  %v203_v19 = vpack.c.bf16 0.0, %v438_v14  ;;  %v448_v24 = vld [vmem:[%s944_s0 + $0x228] sm:$0xff] }
  0x15   :  { %393 = vst [vmem:[%s945_s1 + $0x104] sm:$0xf] %v88_v37  ;;  %v442_v18 = vld [vmem:[%s944_s0 + $0x1a0] sm:$0xff]  ;;  %v208_v21 = vpack.c.bf16 0.0, %v440_v16  ;;  %v450_v26 = vld [vmem:[%s944_s0 + $0x168] sm:$0xff]  ;;  %v228_v29 = vpack.c.bf16 0.0, %v448_v24 }
  0x16   :  { %395 = vst [vmem:[%s945_s1 + $0x8] sm:$0xf] %v93_v39  ;;  %v444_v20 = vld [vmem:[%s944_s0 + $0xe0] sm:$0xff]  ;;  %v213_v23 = vpack.c.bf16 0.0, %v442_v18  ;;  %v452_v28 = vld [vmem:[%s944_s0 + $0xa8] sm:$0xff]  ;;  %v233_v31 = vpack.c.bf16 0.0, %v450_v26 }
  0x17   :  { %397 = vst [vmem:[%s945_s1 + $0x68] sm:$0xf] %v98_v41  ;;  %v446_v22 = vld [vmem:[%s944_s0 + $0x20] sm:$0xff]  ;;  %v218_v25 = vpack.c.bf16 0.0, %v444_v20  ;;  %v454_v30 = vld [vmem:[%s944_s0 + $0x1e8] sm:$0xff]  ;;  %v238_v33 = vpack.c.bf16 0.0, %v452_v28 }
  0x18   :  { %399 = vst [vmem:[%s945_s1 + $0xc8] sm:$0xf] %v103_v43  ;;  %v223_v27 = vpack.c.bf16 0.0, %v446_v22  ;;  %v456_v32 = vld [vmem:[%s944_s0 + $0x128] sm:$0xff]  ;;  %v243_v35 = vpack.c.bf16 0.0, %v454_v30  ;;  %v466_v42 = vld [vmem:[%s944_s0 + $0x230] sm:$0xff] }
  0x19   :  { %401 = vst [vmem:[%s945_s1 + $0x28] sm:$0xf] %v108_v45  ;;  %v458_v34 = vld [vmem:[%s944_s0 + $0x68] sm:$0xff]  ;;  %v248_v37 = vpack.c.bf16 0.0, %v456_v32  ;;  %v468_v44 = vld [vmem:[%s944_s0 + $0x170] sm:$0xff]  ;;  %v484_v60 = vld [vmem:[%s944_s0 + $0x238] sm:$0xff] }
  0x1a   :  { %403 = vst [vmem:[%s945_s1 + $0x88] sm:$0xf] %v113_v47  ;;  %v460_v36 = vld [vmem:[%s944_s0 + $0x1a8] sm:$0xff]  ;;  %v253_v39 = vpack.c.bf16 0.0, %v458_v34  ;;  %v470_v46 = vld [vmem:[%s944_s0 + $0xb0] sm:$0xff]  ;;  %v273_v47 = vpack.c.bf16 0.0, %v466_v42 }
  0x1b   :  { %405 = vst [vmem:[%s945_s1 + $0xe8] sm:$0xf] %v118_v49  ;;  %v462_v38 = vld [vmem:[%s944_s0 + $0xe8] sm:$0xff]  ;;  %v258_v41 = vpack.c.bf16 0.0, %v460_v36  ;;  %v472_v48 = vld [vmem:[%s944_s0 + $0x1f0] sm:$0xff]  ;;  %v278_v49 = vpack.c.bf16 0.0, %v468_v44 }
  0x1c   :  { %407 = vst [vmem:[%s945_s1 + $0x48] sm:$0xf] %v123_v51  ;;  %v464_v40 = vld [vmem:[%s944_s0 + $0x28] sm:$0xff]  ;;  %v263_v43 = vpack.c.bf16 0.0, %v462_v38  ;;  %v474_v50 = vld [vmem:[%s944_s0 + $0x130] sm:$0xff]  ;;  %v283_v51 = vpack.c.bf16 0.0, %v470_v46 }
  0x1d   :  { %409 = vst [vmem:[%s945_s1 + $0xa8] sm:$0xf] %v128_v53  ;;  %v268_v45 = vpack.c.bf16 0.0, %v464_v40  ;;  %v476_v52 = vld [vmem:[%s944_s0 + $0x70] sm:$0xff]  ;;  %v288_v53 = vpack.c.bf16 0.0, %v472_v48  ;;  %v486_v62 = vld [vmem:[%s944_s0 + $0x178] sm:$0xff] }
  0x1e   :  { %411 = vst [vmem:[%s945_s1 + $0x108] sm:$0xf] %v133_v55  ;;  %v478_v54 = vld [vmem:[%s944_s0 + $0x1b0] sm:$0xff]  ;;  %v293_v55 = vpack.c.bf16 0.0, %v474_v50  ;;  %v488_v0 = vld [vmem:[%s944_s0 + $0xb8] sm:$0xff] }
  0x1f   :  { %413 = vst [vmem:[%s945_s1 + $0xc] sm:$0xf] %v138_v57  ;;  %v480_v56 = vld [vmem:[%s944_s0 + $0xf0] sm:$0xff]  ;;  %v298_v57 = vpack.c.bf16 0.0, %v476_v52  ;;  %v490_v2 = vld [vmem:[%s944_s0 + $0x1f8] sm:$0xff] }
  0x20   :  { %415 = vst [vmem:[%s945_s1 + $0x6c] sm:$0xf] %v143_v59  ;;  %v482_v58 = vld [vmem:[%s944_s0 + $0x30] sm:$0xff]  ;;  %v303_v59 = vpack.c.bf16 0.0, %v478_v54  ;;  %v492_v4 = vld [vmem:[%s944_s0 + $0x138] sm:$0xff] }
  0x21   :  { %417 = vst [vmem:[%s945_s1 + $0xcc] sm:$0xf] %v148_v61  ;;  %v308_v61 = vpack.c.bf16 0.0, %v480_v56  ;;  %v494_v6 = vld [vmem:[%s944_s0 + $0x78] sm:$0xff] }
  0x22   :  { %419 = vst [vmem:[%s945_s1 + $0x2c] sm:$0xf] %v153_v63  ;;  %v313_v63 = vpack.c.bf16 0.0, %v482_v58  ;;  %v496_v8 = vld [vmem:[%s944_s0 + $0x1b8] sm:$0xff] }
  0x23   :  { %421 = vst [vmem:[%s945_s1 + $0x8c] sm:$0xf] %v158_v1  ;;  %v318_v1 = vpack.c.bf16 0.0, %v484_v60  ;;  %v498_v10 = vld [vmem:[%s944_s0 + $0xf8] sm:$0xff] }
  0x24   :  { %423 = vst [vmem:[%s945_s1 + $0xec] sm:$0xf] %v163_v3  ;;  %v323_v3 = vpack.c.bf16 0.0, %v486_v62  ;;  %v500_v12 = vld [vmem:[%s944_s0 + $0x38] sm:$0xff]  ;;  %v353_v14 = vpack.c.bf16 0.0, %v498_v10 }
  0x25   :  { %425 = vst [vmem:[%s945_s1 + $0x4c] sm:$0xf] %v168_v5  ;;  %v328_v5 = vpack.c.bf16 0.0, %v488_v0 }
  0x26   :  { %427 = vst [vmem:[%s945_s1 + $0xac] sm:$0xf] %v173_v7  ;;  %v333_v7 = vpack.c.bf16 0.0, %v490_v2 }
  0x27   :  { %429 = vst [vmem:[%s945_s1 + $0x10c] sm:$0xf] %v178_v9  ;;  %v338_v9 = vpack.c.bf16 0.0, %v492_v4 }
  0x28   :  { %431 = vst [vmem:[%s945_s1 + $0x10] sm:$0xf] %v183_v11  ;;  %v343_v11 = vpack.c.bf16 0.0, %v494_v6 }
  0x29   :  { %433 = vst [vmem:[%s945_s1 + $0x70] sm:$0xf] %v188_v13  ;;  %v348_v13 = vpack.c.bf16 0.0, %v496_v8 }
  0x2a   :  { %435 = vst [vmem:[%s945_s1 + $0xd0] sm:$0xf] %v193_v15  ;;  %v358_v15 = vpack.c.bf16 0.0, %v500_v12 }
  0x2b   :  { %437 = vst [vmem:[%s945_s1 + $0x30] sm:$0xf] %v198_v17 }
  0x2c   :  { %439 = vst [vmem:[%s945_s1 + $0x90] sm:$0xf] %v203_v19 }
  0x2d   :  { %441 = vst [vmem:[%s945_s1 + $0xf0] sm:$0xf] %v208_v21 }
  0x2e   :  { %443 = vst [vmem:[%s945_s1 + $0x50] sm:$0xf] %v213_v23 }
  0x2f   :  { %445 = vst [vmem:[%s945_s1 + $0xb0] sm:$0xf] %v218_v25 }
  0x30   :  { %447 = vst [vmem:[%s945_s1 + $0x110] sm:$0xf] %v223_v27 }
  0x31   :  { %449 = vst [vmem:[%s945_s1 + $0x14] sm:$0xf] %v228_v29 }
  0x32   :  { %451 = vst [vmem:[%s945_s1 + $0x74] sm:$0xf] %v233_v31 }
  0x33   :  { %453 = vst [vmem:[%s945_s1 + $0xd4] sm:$0xf] %v238_v33 }
  0x34   :  { %455 = vst [vmem:[%s945_s1 + $0x34] sm:$0xf] %v243_v35 }
  0x35   :  { %457 = vst [vmem:[%s945_s1 + $0x94] sm:$0xf] %v248_v37 }
  0x36   :  { %459 = vst [vmem:[%s945_s1 + $0xf4] sm:$0xf] %v253_v39 }
  0x37   :  { %461 = vst [vmem:[%s945_s1 + $0x54] sm:$0xf] %v258_v41 }
  0x38   :  { %463 = vst [vmem:[%s945_s1 + $0xb4] sm:$0xf] %v263_v43 }
  0x39   :  { %465 = vst [vmem:[%s945_s1 + $0x114] sm:$0xf] %v268_v45 }
  0x3a   :  { %467 = vst [vmem:[%s945_s1 + $0x18] sm:$0xf] %v273_v47 }
  0x3b   :  { %469 = vst [vmem:[%s945_s1 + $0x78] sm:$0xf] %v278_v49 }
  0x3c   :  { %471 = vst [vmem:[%s945_s1 + $0xd8] sm:$0xf] %v283_v51 }
  0x3d   :  { %473 = vst [vmem:[%s945_s1 + $0x38] sm:$0xf] %v288_v53 }
  0x3e   :  { %475 = vst [vmem:[%s945_s1 + $0x98] sm:$0xf] %v293_v55 }
  0x3f   :  { %477 = vst [vmem:[%s945_s1 + $0xf8] sm:$0xf] %v298_v57 }
  0x40   :  { %479 = vst [vmem:[%s945_s1 + $0x58] sm:$0xf] %v303_v59 }
  0x41   :  { %481 = vst [vmem:[%s945_s1 + $0xb8] sm:$0xf] %v308_v61 }
  0x42   :  { %483 = vst [vmem:[%s945_s1 + $0x118] sm:$0xf] %v313_v63 }
  0x43   :  { %485 = vst [vmem:[%s945_s1 + $0x1c] sm:$0xf] %v318_v1 }
  0x44   :  { %487 = vst [vmem:[%s945_s1 + $0x7c] sm:$0xf] %v323_v3 }
  0x45   :  { %489 = vst [vmem:[%s945_s1 + $0xdc] sm:$0xf] %v328_v5 }
  0x46   :  { %491 = vst [vmem:[%s945_s1 + $0x3c] sm:$0xf] %v333_v7 }
  0x47   :  { %493 = vst [vmem:[%s945_s1 + $0x9c] sm:$0xf] %v338_v9 }
  0x48   :  { %495 = vst [vmem:[%s945_s1 + $0xfc] sm:$0xf] %v343_v11 }
  0x49   :  { %497 = vst [vmem:[%s945_s1 + $0x5c] sm:$0xf] %v348_v13 }
  0x4a   :  { %499 = vst [vmem:[%s945_s1 + $0xbc] sm:$0xf] %v353_v14 }
  0x4b   :  { %501 = vst [vmem:[%s945_s1 + $0x11c] sm:$0xf] %v358_v15 }

// kernel: forward.1
= control target key start
LH: loop header
LB: loop body
LE: loop exit
PB: predicated region body
PF: predicated region fallthrough
CT: control target
= control target key end

     0   :  { %vm45_vm0 = vcmask 1041408   ;;  %vm28_vm1 = vcmask 1043456   ;;  %s604_s0 = inlined_call_operand.vmem [shape: f32[2,15,128], index: 0, kind: input, shape index: {}]   ;;  %s605_s1 = inlined_call_operand.vmem [shape: f32[648,128], index: 1, kind: input, shape index: {}]   ;;  %s606_s2 = inlined_call_operand.hbm [shape: f32[2,128], index: 2, kind: output, shape index: {}]  }
   0x1   :  { %v129_v0 = vld [vmem:[%s605_s1 + $0x178] sm:$0xff]  ;;  %v128_v2 = vld [vmem:[%s605_s1 + $0x170] sm:$0xff]  ;;  %v127_v6 = vld [vmem:[%s605_s1 + $0x168] sm:$0xff] }
   0x2   :  { %v97_v1 = vld [vmem:[%s605_s1 + $0x78] sm:$0xff]  ;;  %204 = vmatpush.msra.mxu2 %v129_v0  ;;  %v96_v4 = vld [vmem:[%s605_s1 + $0x70] sm:$0xff]  ;;  %v95_v8 = vld [vmem:[%s605_s1 + $0x68] sm:$0xff] }
   0x3   :  { %164 = vmatpush.msra.mxu0 %v97_v1  ;;  %v145_v3 = vld [vmem:[%s605_s1 + $0x1f8] sm:$0xff]  ;;  %v144_v7 = vld [vmem:[%s605_s1 + $0x1f0] sm:$0xff]  ;;  %v143_v10 = vld [vmem:[%s605_s1 + $0x1e8] sm:$0xff] }
   0x4   :  { %v113_v5 = vld [vmem:[%s605_s1 + $0xf8] sm:$0xff]  ;;  %224 = vmatpush.msra.mxu3 %v145_v3  ;;  %205 = vmatpush.msra.mxu2 %v128_v2  ;;  %v112_v9 = vld [vmem:[%s605_s1 + $0xf0] sm:$0xff]  ;;  %v126_v11 = vld [vmem:[%s605_s1 + $0x160] sm:$0xff] }
   0x5   :  { %184 = vmatpush.msra.mxu1 %v113_v5  ;;  %165 = vmatpush.msra.mxu0 %v96_v4  ;;  %v94_v12 = vld [vmem:[%s605_s1 + $0x60] sm:$0xff]  ;;  %v111_v13 = vld [vmem:[%s605_s1 + $0xe8] sm:$0xff]  ;;  %v125_v16 = vld [vmem:[%s605_s1 + $0x158] sm:$0xff] }
   0x6   :  { %225 = vmatpush.msra.mxu3 %v144_v7  ;;  %206 = vmatpush.msra.mxu2 %v127_v6  ;;  %v142_v14 = vld [vmem:[%s605_s1 + $0x1e0] sm:$0xff]  ;;  %v93_v17 = vld [vmem:[%s605_s1 + $0x58] sm:$0xff]  ;;  %v124_v20 = vld [vmem:[%s605_s1 + $0x150] sm:$0xff] }
   0x7   :  { %185 = vmatpush.msra.mxu1 %v112_v9  ;;  %166 = vmatpush.msra.mxu0 %v95_v8  ;;  %v110_v15 = vld [vmem:[%s605_s1 + $0xe0] sm:$0xff]  ;;  %v141_v18 = vld [vmem:[%s605_s1 + $0x1d8] sm:$0xff]  ;;  %v92_v21 = vld [vmem:[%s605_s1 + $0x50] sm:$0xff] }
   0x8   :  { %226 = vmatpush.msra.mxu3 %v143_v10  ;;  %207 = vmatpush.msra.mxu2 %v126_v11  ;;  %v109_v19 = vld [vmem:[%s605_s1 + $0xd8] sm:$0xff]  ;;  %v140_v22 = vld [vmem:[%s605_s1 + $0x1d0] sm:$0xff]  ;;  %v123_v24 = vld [vmem:[%s605_s1 + $0x148] sm:$0xff] }
   0x9   :  { %186 = vmatpush.msra.mxu1 %v111_v13  ;;  %167 = vmatpush.msra.mxu0 %v94_v12  ;;  %v108_v23 = vld [vmem:[%s605_s1 + $0xd0] sm:$0xff]  ;;  %v91_v25 = vld [vmem:[%s605_s1 + $0x48] sm:$0xff]  ;;  %v122_v28 = vld [vmem:[%s605_s1 + $0x140] sm:$0xff] }
   0xa   :  { %227 = vmatpush.msra.mxu3 %v142_v14  ;;  %208 = vmatpush.msra.mxu2 %v125_v16  ;;  %v139_v26 = vld [vmem:[%s605_s1 + $0x1c8] sm:$0xff]  ;;  %v90_v29 = vld [vmem:[%s605_s1 + $0x40] sm:$0xff]  ;;  %v121_v32 = vld [vmem:[%s605_s1 + $0x138] sm:$0xff] }
   0xb   :  { %187 = vmatpush.msra.mxu1 %v110_v15  ;;  %168 = vmatpush.msra.mxu0 %v93_v17  ;;  %v107_v27 = vld [vmem:[%s605_s1 + $0xc8] sm:$0xff]  ;;  %v138_v30 = vld [vmem:[%s605_s1 + $0x1c0] sm:$0xff]  ;;  %v89_v33 = vld [vmem:[%s605_s1 + $0x38] sm:$0xff] }
   0xc   :  { %228 = vmatpush.msra.mxu3 %v141_v18  ;;  %209 = vmatpush.msra.mxu2 %v124_v20  ;;  %v106_v31 = vld [vmem:[%s605_s1 + $0xc0] sm:$0xff]  ;;  %v137_v34 = vld [vmem:[%s605_s1 + $0x1b8] sm:$0xff]  ;;  %v120_v36 = vld [vmem:[%s605_s1 + $0x130] sm:$0xff] }
   0xd   :  { %188 = vmatpush.msra.mxu1 %v109_v19  ;;  %169 = vmatpush.msra.mxu0 %v92_v21  ;;  %v105_v35 = vld [vmem:[%s605_s1 + $0xb8] sm:$0xff]  ;;  %v88_v37 = vld [vmem:[%s605_s1 + $0x30] sm:$0xff]  ;;  %v119_v40 = vld [vmem:[%s605_s1 + $0x128] sm:$0xff] }
   0xe   :  { %229 = vmatpush.msra.mxu3 %v140_v22  ;;  %210 = vmatpush.msra.mxu2 %v123_v24  ;;  %v136_v38 = vld [vmem:[%s605_s1 + $0x1b0] sm:$0xff]  ;;  %v87_v41 = vld [vmem:[%s605_s1 + $0x28] sm:$0xff]  ;;  %v118_v42 = vld [vmem:[%s605_s1 + $0x120] sm:$0xff] }
   0xf   :  { %189 = vmatpush.msra.mxu1 %v108_v23  ;;  %170 = vmatpush.msra.mxu0 %v91_v25  ;;  %v104_v39 = vld [vmem:[%s605_s1 + $0xb0] sm:$0xff]  ;;  %v135_v43 = vld [vmem:[%s605_s1 + $0x1a8] sm:$0xff]  ;;  %v86_v44 = vld [vmem:[%s605_s1 + $0x20] sm:$0xff] }
  0x10   :  { %230 = vmatpush.msra.mxu3 %v139_v26  ;;  %211 = vmatpush.msra.mxu2 %v122_v28  ;;  %v103_v45 = vld [vmem:[%s605_s1 + $0xa8] sm:$0xff]  ;;  %v117_v46 = vld [vmem:[%s605_s1 + $0x118] sm:$0xff]  ;;  %v134_v49 = vld [vmem:[%s605_s1 + $0x1a0] sm:$0xff] }
  0x11   :  { %190 = vmatpush.msra.mxu1 %v107_v27  ;;  %171 = vmatpush.msra.mxu0 %v90_v29  ;;  %v43_v47 = vld [vmem:[%s604_s0 + $0xc] sm:$0x3]  ;;  %v44_v48 = vld [vmem:[%s604_s0 + $0x1c] sm:$0x3]  ;;  %v102_v50 = vld [vmem:[%s605_s1 + $0xa0] sm:$0xff] }
  0x12   :  { %231 = vmatpush.msra.mxu3 %v138_v30  ;;  %212 = vmatpush.msra.mxu2 %v121_v32  ;;  %v46_v51 = vsel %vm45_vm0, %v43_v47, 0.0  ;;  %v53_v52 = vsel %vm45_vm0, %v44_v48, 0.0  ;;  %v12_v53 = vld [vmem:[%s604_s0] sm:$0xff]  ;;  %v85_v54 = vld [vmem:[%s605_s1 + $0x18] sm:$0xff]  ;;  %v13_v58 = vld [vmem:[%s604_s0 + $0x10] sm:$0xff] }
  0x13   :  { %191 = vmatpush.msra.mxu1 %v106_v31  ;;  %172 = vmatpush.msra.mxu0 %v89_v33  ;;  %v133_v55 = vld [vmem:[%s605_s1 + $0x198] sm:$0xff]  ;;  %v47_v56 = vrot.slane %v46_v51, 4  ;;  %v54_v57 = vrot.slane %v53_v52, 4  ;;  %v14_v59 = vrot.slane %v12_v53, 4  ;;  %v20_v61 = vrot.slane %v13_v58, 4  ;;  %v116_v0 = vld [vmem:[%s605_s1 + $0x110] sm:$0xff] }
  0x14   :  { %232 = vmatpush.msra.mxu3 %v137_v34  ;;  %213 = vmatpush.msra.mxu2 %v120_v36  ;;  %v101_v60 = vld [vmem:[%s605_s1 + $0x98] sm:$0xff]  ;;  %v26_v63 = vld [vmem:[%s604_s0 + $0x8] sm:$0xf]  ;;  %v84_v1 = vld [vmem:[%s605_s1 + $0x10] sm:$0xff] }
  0x15   :  { %192 = vmatpush.msra.mxu1 %v105_v35  ;;  %173 = vmatpush.msra.mxu0 %v88_v37  ;;  %v61_v62 = vld [vmem:[%s604_s0 + $0x1e] sm:$0x1]  ;;  %v48_v2 = vadd.f32 %v47_v56, %v46_v51  ;;  %v55_v3 = vadd.f32 %v54_v57, %v53_v52  ;;  %v15_v4 = vadd.f32 %v14_v59, %v12_v53  ;;  %v27_v5 = vld [vmem:[%s604_s0 + $0x18] sm:$0xf]  ;;  %v115_v6 = vld [vmem:[%s605_s1 + $0x108] sm:$0xff]  ;;  %v29_v10 = vsel %vm28_vm1, %v26_v63, 0.0 }
  0x16   :  { %233 = vmatpush.msra.mxu3 %v136_v38  ;;  %214 = vmatpush.msra.mxu2 %v119_v40  ;;  %v132_v7 = vld [vmem:[%s605_s1 + $0x190] sm:$0xff]  ;;  %v21_v9 = vadd.f32 %v20_v61, %v13_v58  ;;  %v36_v11 = vsel %vm28_vm1, %v27_v5, 0.0  ;;  %v83_v12 = vld [vmem:[%s605_s1 + $0x8] sm:$0xff]  ;;  %v79_v17 = vrot.slane %v61_v62, 7  ;;  %v30_v21 = vrot.slane %v29_v10, 4  ;;  %v114_v23 = vld [vmem:[%s605_s1 + $0x100] sm:$0xff] }
  0x17   :  { %193 = vmatpush.msra.mxu1 %v104_v39  ;;  %174 = vmatpush.msra.mxu0 %v87_v41  ;;  %v100_v8 = vld [vmem:[%s605_s1 + $0x90] sm:$0xff]  ;;  %v131_v13 = vld [vmem:[%s605_s1 + $0x188] sm:$0xff]  ;;  %v49_v14 = vrot.slane %v48_v2, 2  ;;  %v56_v15 = vrot.slane %v55_v3, 2  ;;  %v16_v16 = vrot.slane %v15_v4, 2  ;;  %v37_v22 = vrot.slane %v36_v11, 4 }
  0x18   :  { %234 = vmatpush.msra.mxu3 %v135_v43  ;;  %215 = vmatpush.msra.mxu2 %v118_v42  ;;  %v99_v18 = vld [vmem:[%s605_s1 + $0x88] sm:$0xff]  ;;  %v22_v19 = vrot.slane %v21_v9, 2  ;;  %v82_v26 = vld [vmem:[%s605_s1] sm:$0xff] }
  0x19   :  { %194 = vmatpush.msra.mxu1 %v103_v45  ;;  %175 = vmatpush.msra.mxu0 %v86_v44  ;;  %v60_v20 = vld [vmem:[%s604_s0 + $0xe] sm:$0x1]  ;;  %v50_v24 = vadd.f32 %v49_v14, %v48_v2  ;;  %v57_v25 = vadd.f32 %v56_v15, %v55_v3  ;;  %v17_v27 = vadd.f32 %v16_v16, %v15_v4 }
  0x1a   :  { %235 = vmatpush.msra.mxu3 %v134_v49  ;;  %216 = vmatpush.msra.mxu2 %v117_v46 }
  0x1b   :  { %195 = vmatpush.msra.mxu1 %v102_v50  ;;  %176 = vmatpush.msra.mxu0 %v85_v54 }
  0x1c   :  { %236 = vmatpush.msra.mxu3 %v133_v55  ;;  %217 = vmatpush.msra.mxu2 %v116_v0 }
  0x1d   :  { %196 = vmatpush.msra.mxu1 %v101_v60  ;;  %177 = vmatpush.msra.mxu0 %v84_v1 }
  0x1e   :  { %237 = vmatpush.msra.mxu3 %v132_v7 }
  0x1f   :  { %197 = vmatpush.msra.mxu1 %v100_v8 }
  0x20   :  { %7 = vsyncpa [#allocation3], 0  ;;  %218 = vmatpush.msra.mxu2 %v115_v6  ;;  %178 = vmatpush.msra.mxu0 %v83_v12  ;;  %vm66_vm2 = vcmask 1041409   ;;  %v130_v28 = vld [vmem:[%s605_s1 + $0x180] sm:$0xff]  ;;  %v23_v29 = vadd.f32 %v22_v19, %v21_v9  ;;  %v31_v31 = vadd.f32 %v30_v21, %v29_v10  ;;  %v38_v32 = vadd.f32 %v37_v22, %v36_v11  ;;  %v161_v37 = vld [vmem:[%s605_s1 + $0x278] sm:$0xff]  ;;  %s310_s17 = smov [#allocation2]  }
  0x21   :  { %v98_v30 = vld [vmem:[%s605_s1 + $0x80] sm:$0xff]  ;;  %238 = vmatpush.msra.mxu3 %v131_v13  ;;  %v51_v33 = vrot.slane %v50_v24, 1  ;;  %v58_v34 = vrot.slane %v57_v25, 1  ;;  %198 = vmatpush.msra.mxu1 %v99_v18  ;;  %v18_v35 = vrot.slane %v17_v27, 1  ;;  %v80_v36 = vsel %vm66_vm2, %v79_v17, %v60_v20  ;;  %v160_v44 = vld [vmem:[%s605_s1 + $0x270] sm:$0xff]  ;;  %v159_v49 = vld [vmem:[%s605_s1 + $0x268] sm:$0xff] }
  0x22   :  { %219 = vmatpush.msra.mxu2 %v114_v23  ;;  %179 = vmatpush.msra.mxu0 %v82_v26  ;;  %v24_v38 = vrot.slane %v23_v29, 1  ;;  %v32_v39 = vrot.slane %v31_v31, 2  ;;  %v39_v40 = vrot.slane %v38_v32, 2  ;;  %v158_v53 = vld [vmem:[%s605_s1 + $0x260] sm:$0xff]  ;;  %v157_v56 = vld [vmem:[%s605_s1 + $0x258] sm:$0xff]  ;;  %v156_v58 = vld [vmem:[%s605_s1 + $0x250] sm:$0xff] }
  0x23   :  { %v52_v41 = vadd.f32 %v51_v33, %v50_v24  ;;  %v59_v42 = vadd.f32 %v58_v34, %v57_v25  ;;  %239 = vmatpush.msra.mxu3 %v130_v28  ;;  %v19_v43 = vadd.f32 %v18_v35, %v17_v27  ;;  %199 = vmatpush.msra.mxu1 %v98_v30  ;;  %v155_v59 = vld [vmem:[%s605_s1 + $0x248] sm:$0xff]  ;;  %v154_v60 = vld [vmem:[%s605_s1 + $0x240] sm:$0xff]  ;;  %v153_v61 = vld [vmem:[%s605_s1 + $0x238] sm:$0xff]  ;;  %s272_s18 = sshll.u32 %s310_s17, 4  ;;  %s274_s21 = sshll.u32 %s606_s2, 4  ;;  %s273_s18 = int_to_ptr.vmem [resolvable:$true] %s272_s18  ;;  %s275_s21 = int_to_ptr.hbm [resolvable:$true] %s274_s21 }
  0x24   :  { %v25_v45 = vadd.f32 %v24_v38, %v23_v29  ;;  %240 = vmatmul.f32.vlgmr.msra.gmra.mxu3 %v80_v36  ;;  %v33_v46 = vadd.f32 %v32_v39, %v31_v31  ;;  %v40_v47 = vadd.f32 %v39_v40, %v38_v32  ;;  %246 = vmatpush.msrb.mxu0 %v161_v37  ;;  %v152_v62 = vld [vmem:[%s605_s1 + $0x230] sm:$0xff]  ;;  %v151_v63 = vld [vmem:[%s605_s1 + $0x228] sm:$0xff]  ;;  %v150_v0 = vld [vmem:[%s605_s1 + $0x220] sm:$0xff] }
  0x25   :  { %v75_v48 = vsel %vm66_vm2, %v59_v42, %v52_v41  ;;  %v149_v1 = vld [vmem:[%s605_s1 + $0x218] sm:$0xff]  ;;  %v148_v2 = vld [vmem:[%s605_s1 + $0x210] sm:$0xff]  ;;  %v147_v3 = vld [vmem:[%s605_s1 + $0x208] sm:$0xff] }
  0x26   :  { %220 = vmatmul.f32.vlgmr.msra.gmra.mxu2 %v75_v48  ;;  %v67_v50 = vsel %vm66_vm2, %v25_v45, %v19_v43  ;;  %v34_v51 = vrot.slane %v33_v46, 1  ;;  %v41_v52 = vrot.slane %v40_v47, 1  ;;  %247 = vmatpush.msrb.mxu0 %v160_v44  ;;  %v146_v4 = vld [vmem:[%s605_s1 + $0x200] sm:$0xff] }
  0x27   :  { %180 = vmatmul.f32.vlgmr.msra.gmra.mxu0 %v67_v50  ;;  %v162_v5 = vld [vmem:[%s605_s1 + $0x280] sm:$0x3] }
  0x28   :  { %v35_v54 = vadd.f32 %v34_v51, %v33_v46  ;;  %v42_v55 = vadd.f32 %v41_v52, %v40_v47  ;;  %248 = vmatpush.msrb.mxu0 %v159_v49  ;;  %v163_v6 = vperm.slane %v162_v5, 0  ;;  %v245_v16 = vperm.slane %v162_v5, 1 }
  0x2a   :  { %v71_v57 = vsel %vm66_vm2, %v42_v55, %v35_v54  ;;  %249 = vmatpush.msrb.mxu0 %v158_v53 }
  0x2b   :  { %200 = vmatmul.f32.vlgmr.msra.gmra.mxu1 %v71_v57 }
  0x2c   :  { %250 = vmatpush.msrb.mxu0 %v157_v56 }
  0x2e   :  { %251 = vmatpush.msrb.mxu0 %v156_v58 }
  0x30   :  { %252 = vmatpush.msrb.mxu0 %v155_v59 }
  0x32   :  { %253 = vmatpush.msrb.mxu0 %v154_v60 }
  0x34   :  { %254 = vmatpush.msrb.mxu0 %v153_v61 }
  0x36   :  { %255 = vmatpush.msrb.mxu0 %v152_v62 }
  0x38   :  { %256 = vmatpush.msrb.mxu0 %v151_v63 }
  0x3a   :  { %257 = vmatpush.msrb.mxu0 %v150_v0 }
  0x3c   :  { %258 = vmatpush.msrb.mxu0 %v149_v1 }
  0x3e   :  { %259 = vmatpush.msrb.mxu0 %v148_v2 }
  0x40   :  { %260 = vmatpush.msrb.mxu0 %v147_v3 }
  0x42   :  { %261 = vmatpush.msrb.mxu0 %v146_v4 }
  0xa4   :  { %v181_v7 = vpop.f32.mrf.mxu0 }
  0xa5   :  { %v182_v8 = vadd.f32 %v181_v7, %v163_v6 }
  0xa7   :  { %v241_v12 = vpop.f32.mrf.mxu3 }
  0xa8   :  { %v201_v9 = vpop.f32.mrf.mxu1 }
  0xa9   :  { %v202_v10 = vadd.f32 %v201_v9, %v182_v8  ;;  %v221_v11 = vpop.f32.mrf.mxu2 }
  0xab   :  { %v222_v13 = vadd.f32 %v221_v11, %v202_v10 }
  0xad   :  { %v242_v14 = vadd.f32 %v241_v12, %v222_v13 }
  0xaf   :  { %v244_v15 = vmax.f32 %v242_v14, 0.0 }
  0xb1   :  { %262 = vmatmul.f32.vlgmr.msrb.gmra.mxu0 %v244_v15 }
 0x12e   :  { %v263_v17 = vpop.f32.mrf.mxu0 }
 0x12f   :  { %v264_v18 = vadd.f32 %v263_v17, %v245_v16 }
 0x131   :  { %266 = vst [vmem:[#allocation2] sm:$0x3] %v264_v18 }
 0x132   :  { %277 = dma.vmem_to_hbm [thread:$0]  %s273_s18, 32, %s275_s21, [#allocation3]  }
 0x133   :  { %308 = dma.done.wait [#allocation3], 32  }
 0x134   :  { %309 = vsyncadd [#allocation3], 4294967264 }
 0x135   :  { %282 = vsyncpa [#allocation3], 1 }

</bundles_post_ra>
